<compile_context>
chip_gen: v6e
topology: v6e:2x2x1
jax: 0.10.0
libtpu: 0.0.40
codegen_flags: <defaults>
</compile_context>

<pallas_src>
import functools
import math

import jax
import jax.numpy as jnp
from jax.experimental import pallas as pl
from jax.experimental.pallas import tpu as pltpu


def _fengwu_kernel(x_ref, o_ref, *, delta_t):
    half = pl.program_id(3)
    d = jnp.asarray(delta_t, dtype=o_ref.dtype)  # hoisted scalar constant

    @pl.when(half == 0)
    def _():
        # Data half: pure load + add + store stream (VPU has huge slack here).
        o_ref[...] = x_ref[...] + d

    @pl.when(half == 1)
    def _():
        # Constant half: deterministic stand-in for empty_like (zeros) + delta_t.
        o_ref[...] = jnp.broadcast_to(d, o_ref.shape)


def _pick_lane_split(spatial, itemsize, max_block_bytes):
    """Factor spatial = S1 * S2 (contiguous re-split of H*W).

    S2 becomes the lane (last) dim of every block.  Prefer divisors that are
    lane-dense (fraction of a 128-lane vreg actually used), that fit the
    per-block byte budget even for a single row, and that are of moderate size
    so the S1 axis keeps tiling granularity.
    """
    divisors = set()
    d = 1
    while d * d <= spatial:
        if spatial % d == 0:
            divisors.add(d)
            divisors.add(spatial // d)
        d += 1

    def score(d):
        lanes = -(-d // 128) * 128              # padded lane extent
        eff = d / lanes                          # unmasked-lane fraction
        fits = d * itemsize <= max_block_bytes   # a single row fits the budget
        return (fits, round(eff, 2), -abs(d - 2048))

    s2 = max(divisors, key=score)
    return spatial // s2, s2


def fengwu_forward(x, delta_t=6, *, max_block_bytes=4 << 20,
                   vmem_limit_bytes=40 << 20):
    """x: [B, C, H, W] with C > 69. Returns [B, 2*(C-69), H, W]."""
    B, C, H, W = x.shape
    assert C > 69, "FengWu model expects > 69 channels"
    cr = C - 69
    spatial = H * W
    itemsize = jnp.dtype(x.dtype).itemsize

    # ---- lane-dense spatial split (free contiguous re-split of NCHW) ----
    if W % 128 == 0:
        s1, s2 = H, W                            # already lane-dense; no reshape
    else:
        s1, s2 = _pick_lane_split(spatial, itemsize, max_block_bytes)
    x4 = x if (s1, s2) == (H, W) else x.reshape(B, C, s1, s2)

    # ---- channel block: must divide gcd(cr, 69) so the input offset 69 is
    #      block-aligned (slice folded into the index_map); capped so a
    #      minimum-height block stays under the byte budget ----
    g = math.gcd(cr, 69)
    min_rows = min(8, s1)
    ccb = 1
    for d in sorted((d for d in range(1, g + 1) if g % d == 0), reverse=True):
        if d * min_rows * s2 * itemsize <= max_block_bytes:
            ccb = d
            break
    nco = cr // ccb                              # channel blocks per output half
    c_in0 = 69 // ccb                            # input block index of channel 69

    # ---- row tile: largest multiple of 8 under the byte budget; ragged last
    #      block handled by a cdiv grid (masked stores) ----
    row_bytes = max(1, ccb * s2 * itemsize)
    t_budget = max(1, max_block_bytes // row_bytes)
    if t_budget >= s1:
        ts1 = s1                                 # full extent: always layout-legal
    else:
        ts1 = max(8, (t_budget // 8) * 8)        # sublane-aligned tile
        if ts1 > s1:
            ts1 = s1                             # s1 < 8: take the full extent
    ns = -(-s1 // ts1)                           # cdiv

    grid = (B, nco, ns, 2)   # (batch, channel block, row block, half); half fastest
    block = (1, ccb, ts1, s2)

    cost = pl.CostEstimate(
        flops=2 * B * cr * spatial,
        transcendentals=0,
        bytes_accessed=3 * B * cr * spatial * itemsize,   # 1 read + 2 writes
    )

    out4 = pl.pallas_call(
        functools.partial(_fengwu_kernel, delta_t=float(delta_t)),
        out_shape=jax.ShapeDtypeStruct((B, 2 * cr, s1, s2), x.dtype),
        grid=grid,
        in_specs=[
            # Same input block for half=0 and half=1 -> the redundant input DMA
            # on constant-half steps is skipped by the pipeline.
            pl.BlockSpec(block, lambda b, c, s, half: (b, c_in0 + c, s, 0)),
        ],
        out_specs=pl.BlockSpec(
            block, lambda b, c, s, half: (b, half * nco + c, s, 0)
        ),
        compiler_params=pltpu.CompilerParams(
            dimension_semantics=("parallel", "parallel", "parallel", "arbitrary"),
            vmem_limit_bytes=vmem_limit_bytes,
        ),
        cost_estimate=cost,
    )(x4)

    if (s1, s2) == (H, W):
        return out4
    return out4.reshape(B, 2 * cr, H, W)


if __name__ == "__main__":
    key = jax.random.PRNGKey(0)
    # Small but consistent with the module: channel dim must exceed 69.
    B, C, H, W = 2, 73, 16, 16   # cr = C - 69 = 4
    delta_t = 6

    x = jax.random.normal(key, (B, C, H, W), dtype=jnp.float32)

    out = fengwu_forward(x, delta_t=delta_t)
    out = jax.block_until_ready(out)

    # Reference (pure JAX), with empty_like interpreted as zeros.
    ref = jnp.concatenate(
        [x[:, 69:] + delta_t, jnp.full_like(x[:, 69:], float(delta_t))], axis=1
    )

    assert out.shape == (B, 2 * (C - 69), H, W), out.shape
    assert jnp.allclose(out, ref, atol=1e-6), "mismatch vs reference"

    print("KERNEL_OK")
</pallas_src>

<mosaic_0001>
module attributes {stable_mosaic.version = 11 : i64} {
  func.func @_fengwu_kernel(%arg0: i32, %arg1: i32, %arg2: i32, %arg3: i32, %arg4: memref<1x1x1x256xf32, #tpu.memory_space<vmem>>, %arg5: memref<1x1x1x256xf32, #tpu.memory_space<vmem>>) attributes {dimension_semantics = [#tpu.dimension_semantics<parallel>, #tpu.dimension_semantics<parallel>, #tpu.dimension_semantics<parallel>, #tpu.dimension_semantics<arbitrary>], iteration_bounds = array<i64: 2, 4, 1, 2>, scalar_prefetch = 0 : i64, scratch_operands = 0 : i64, tpu.core_type = #tpu.core_type<tc>, window_params = [{transform_indices = @transform_0, window_bounds = array<i64: 1, 1, 1, 256>}, {transform_indices = @transform_1, window_bounds = array<i64: 1, 1, 1, 256>}]} {
    %c0_i32 = arith.constant 0 : i32
    %0 = arith.cmpi eq, %arg3, %c0_i32 : i32
    %1 = arith.extui %0 : i1 to i32
    %cst = arith.constant 6.000000e+00 : f32
    %c0_i32_0 = arith.constant 0 : i32
    %2 = arith.cmpi ne, %1, %c0_i32_0 : i32
    scf.if %2 {
      %c0 = arith.constant 0 : index
      %c0_3 = arith.constant 0 : index
      %c0_4 = arith.constant 0 : index
      %c0_5 = arith.constant 0 : index
      %6 = vector.load %arg4[%c0, %c0_3, %c0_4, %c0_5] : memref<1x1x1x256xf32, #tpu.memory_space<vmem>>, vector<1x1x1x256xf32>
      %7 = vector.broadcast %cst : f32 to vector<1x1x1x256xf32>
      %8 = arith.addf %6, %7 : vector<1x1x1x256xf32>
      %c0_6 = arith.constant 0 : index
      %c0_7 = arith.constant 0 : index
      %c0_8 = arith.constant 0 : index
      %c0_9 = arith.constant 0 : index
      %9 = vector.load %arg5[%c0_6, %c0_7, %c0_8, %c0_9] : memref<1x1x1x256xf32, #tpu.memory_space<vmem>>, vector<1x1x1x256xf32>
      tpu.vector_store %arg5[%c0_6, %c0_7, %c0_8, %c0_9], %8 {strides = array<i32>} : memref<1x1x1x256xf32, #tpu.memory_space<vmem>>, vector<1x1x1x256xf32>,
    } else {
    }
    %c1_i32 = arith.constant 1 : i32
    %3 = arith.cmpi eq, %arg3, %c1_i32 : i32
    %4 = arith.extui %3 : i1 to i32
    %cst_1 = arith.constant 6.000000e+00 : f32
    %c0_i32_2 = arith.constant 0 : i32
    %5 = arith.cmpi ne, %4, %c0_i32_2 : i32
    scf.if %5 {
      %6 = vector.broadcast %cst_1 : f32 to vector<1x1x1x256xf32>
      %c0 = arith.constant 0 : index
      %c0_3 = arith.constant 0 : index
      %c0_4 = arith.constant 0 : index
      %c0_5 = arith.constant 0 : index
      %7 = vector.load %arg5[%c0, %c0_3, %c0_4, %c0_5] : memref<1x1x1x256xf32, #tpu.memory_space<vmem>>, vector<1x1x1x256xf32>
      tpu.vector_store %arg5[%c0, %c0_3, %c0_4, %c0_5], %6 {strides = array<i32>} : memref<1x1x1x256xf32, #tpu.memory_space<vmem>>, vector<1x1x1x256xf32>,
    } else {
    }
    return
  }
  func.func @transform_0(%arg0: i32, %arg1: i32, %arg2: i32, %arg3: i32) -> (i32, i32, i32, i32) {
    %c69_i32 = arith.constant 69 : i32
    %0 = arith.addi %c69_i32, %arg1 : i32
    %c0_i32 = arith.constant 0 : i32
    %c0_i32_0 = arith.constant 0 : i32
    return %arg0, %0, %arg2, %c0_i32 : i32, i32, i32, i32
  }
  func.func @transform_1(%arg0: i32, %arg1: i32, %arg2: i32, %arg3: i32) -> (i32, i32, i32, i32) {
    %c4_i32 = arith.constant 4 : i32
    %0 = arith.muli %arg3, %c4_i32 : i32
    %1 = arith.addi %0, %arg1 : i32
    %c0_i32 = arith.constant 0 : i32
    %c0_i32_0 = arith.constant 0 : i32
    return %arg0, %1, %arg2, %c0_i32 : i32, i32, i32, i32
  }
}

</mosaic_0001>

<bundles_post_ra>
// kernel: tpu_custom_call.1
= control target key start
LH: loop header
LB: loop body
LE: loop exit
PB: predicated region body
PF: predicated region fallthrough
CT: control target
= control target key end

     0   :  { %6 = vsyncpa [#allocation3], 0  ;;  %s865_s0 = inlined_call_operand.hbm [shape: f32[2,73,1,256], index: 0, kind: input, shape index: {}]   ;;  %s866_s1 = inlined_call_operand.hbm [shape: f32[2,8,1,256], index: 1, kind: output, shape index: {}]  }
   0x1   :  { %8 = vsyncpa [#allocation3 + $0x1], 0 }
   0x2   :  { %9 = vsyncpa [#allocation4], 0 }
   0x3   :  { %11 = vsyncpa [#allocation4 + $0x1], 0  ;;  %s645_s6 = smov 0   ;;  %s647_s7 = smov 0  }
   0x4   :  { %s649_s8 = smov 0   ;;  %s651_s9 = smov 0  }
   0x5   :  { %s653_s10 = smov 0   ;;  %s655_s11 = smov 0  }
   0x6   :  { %s657_s12 = smov 0   ;;  %s659_s13 = smov 0  }
   0x7   :  { %s661_s14 = smov 0   ;;  %s663_s15 = smov 0  }
   0x8   :  { %s665_s16 = smov 0   ;;  %s667_s17 = smov 0  }
   0x9   :  { %s669_s18 = smov 0  }
   0xa LB: > { %874 = sst [smem:[#allocation8_spill]] %s618_s15  ;;  %s867_s19 = sadd.s32 4294967295, %s630_s18   ;;  %s630_s18 = sphi %s669_s18, %s17_s18   ;;  %s626_s17 = sphi %s667_s17, %s896_s17   ;;  %s622_s16 = sphi %s665_s16, %s895_s16   ;;  %s618_s15 = sphi %s663_s15, %s894_s15   ;;  %s614_s14 = sphi %s661_s14, %s893_s14   ;;  %s610_s13 = sphi %s659_s13, %s892_s13   ;;  %s606_s12 = sphi %s657_s12, %s891_s12   ;;  %s602_s11 = sphi %s655_s11, %s902_s11   ;;  %s598_s10 = sphi %s653_s10, %s901_s10   ;;  %s594_s9 = sphi %s651_s9, %s900_s9   ;;  %s590_s8 = sphi %s649_s8, %s899_s8   ;;  %s586_s7 = sphi %s647_s7, %s898_s7   ;;  %s582_s6 = sphi %s645_s6, %s897_s6  }
   0xb   : > { %875 = sst [smem:[#allocation9_spill]] %s622_s16  ;;  %s32_s21 = sadd.s32 1, %s618_s15 }
   0xc   : > { %876 = sst [smem:[#allocation10_spill]] %s626_s17  ;;  %s39_s22 = sadd.s32 1, %s622_s16 }
   0xd   : > { %p33_p0 = scmp.ge.s32.totalorder %s32_s21, 2  ;;  %s43_s23 = sadd.s32 1, %s626_s17 }
   0xe   : > { %s47_s24 = sadd.s32 69, %s622_s16  ;;  %s56_s25 = sadd.s32 1, %s602_s11 }
   0xf   : > { %s904_s21 = smov (%p33_p0, %s32_s21), 0  ;;  %s906_s22 = smov (!%p33_p0, %s39_s22), %s622_s16 }
  0x10   : > { %877 = sst [smem:[#allocation11_spill]] %s904_s21  ;;  %p63_p1 = scmp.ne.s32.totalorder %s602_s11, %s598_s10 }
  0x11   : > { %p64_p2 = scmp.eq.s32.totalorder %s630_s18, 0  ;;  %p41_p3 = scmp.ge.s32.totalorder %s906_s22, 4 }
  0x12   : > { %p69_p4 = scmp.ne.s32.totalorder %s598_s10, %s594_s9  ;;  %p70_p6 = scmp.eq.s32.totalorder %s867_s19, 0 }
  0x13   : > { %p722_p5 = por %p64_p2, %p63_p1  ;;  %s908_s22 = smov (%p41_p3, %s906_s22), 0 }
  0x14   : > { %879 = sst [smem:[#allocation12_spill]] %s908_s22  ;;  %s910_s23 = smov (!%p41_p3, %s43_s23), %s626_s17 }
  0x15   : > { %s48_s27 = sadd.s32 69, %s908_s22  ;;  %p732_p7 = por %p70_p6, %p69_p4 }
  0x16   : > { %p45_p8 = scmp.ge.s32.totalorder %s910_s23, 2  ;;  %s50_s29 = ssub.s32 %s47_s24, %s48_s27 }
  0x17   : > { %s327_s30 = sshll.u32 %s618_s15, 2  ;;  %s328_s2 = sshll.u32 %s904_s21, 2 }
  0x18   : > { %s912_s23 = smov (%p45_p8, %s910_s23), 0  ;;  %s80_s3 = sadd.s32 %s622_s16, %s327_s30 }
  0x19   : > { %881 = sst [smem:[#allocation13_spill]] %s912_s23  ;;  %s82_s4 = sadd.s32 %s328_s2, %s908_s22 }
  0x1a   : > { %s49_s5 = ssub.s32 %s626_s17, %s912_s23  ;;  %s84_s9 = ssub.s32 %s80_s3, %s82_s4 }
  0x1b   : > { %s51_s20 = sor.u32 %s50_s29, %s49_s5  ;;  %s85_s19 = sor.u32 %s84_s9, %s49_s5 }
  0x1c   : > { %p54_p9 = scmp.eq.s32.totalorder %s51_s20, 0  ;;  %p88_p10 = scmp.eq.s32.totalorder %s85_s19, 0 }
  0x1d   : > { %s90_s24 = sadd.s32 1, %s590_s8  ;;  %p100_p11 = scmp.ne.s32.totalorder %s590_s8, %s586_s7 }
  0x1e   : > { %s748_s27 = scalar_select %p54_p9, %s602_s11, %s56_s25  }
  0x1f   : > { %s751_s21 = scalar_select %p88_p10, %s590_s8, %s90_s24  }
  0x20   : > { %882 = sst [smem:[#allocation14_spill]] %s748_s27  ;;  %s883_s15 = sadd.s32 4294967295, %s630_s18  }
  0x21   : > { %p101_p12 = scmp.eq.s32.totalorder %s883_s15, 15  ;;  %p106_p13 = scmp.ne.s32.totalorder %s586_s7, %s582_s6 }
  0x22   : > { %s884_s30 = sadd.s32 4294967294, %s630_s18   ;;  %p358_p2 = scmp.lt.s32.totalorder %s630_s18, 16 }
  0x23   : > { %p107_p0 = scmp.eq.s32.totalorder %s884_s30, 15  ;;  %p759_p1 = por %p101_p12, %p100_p11 }
  0x24   : > { %s127_s20 = sand.u32 1, %s602_s11   ;;  %s332_s2 = sshll.u32 %s622_s16, 1 }
  0x25   : > { %p764_p3 = por %p107_p0, %p106_p13  ;;  %s331_s25 = sshll.u32 %s127_s20, 1 }
  0x26   : > { %s252_s3 = smul.u32 146, %s626_s17  ;;  %s131_s4 = scalar_lea.vmem [#allocation2], %s331_s25 }
  0x27   : > { %s886_s19 = scalar_select %p764_p3, 1, 0 }
  0x28   : > { %s144_s5 = sshll.u32 %s131_s4, 4  ;;  %p773_p4 = pnand %p358_p2, %p722_p5  ;;  %s145_s5 = int_to_ptr.vmem [resolvable:$true] %s144_s5 }
  0x29   : > { %s253_s9 = sadd.s32 %s332_s2, %s252_s3  ;;  %p334_p6 = scmp.ge.s32.totalorder %s630_s18, 1 }
  0x2a   : > { %s333_s24 = sshll.u32 %s253_s9, 4  ;;  %p149_p8 = scmp.lt.s32.totalorder %s630_s18, 17 }
  0x2b   : > { %s255_s22 = scalar_lea.hbm %s865_s0, %s333_s24  ;;  %s128_s16 = scalar_lea.sflag [#allocation3], %s127_s20 }
  0x2c   : > { %s256_s27 = scalar_lea.hbm %s255_s22, 2208  ;;  %p467_p9 = pneg %p773_p4 }
  0x2d   : > { %s478_s25 = scalar_lea.vmem %s145_s5, 32  ;;  %s632_s26 = smov [#allocation2]  }
  0x2e   : > { %p479_p10 = scmp.ne.s32.totalorder %s145_s5, %s478_s25  ;;  %s483_s4 = sshll.u32 %s632_s26, 4  ;;  %s484_s4 = int_to_ptr.vmem [resolvable:$false] %s483_s4 }
  0x2f   : > { %s485_s17 = scalar_lea.vmem %s484_s4, 64  ;;  %p486_p12 = scmp.lt.s32.totalorder %s145_s5, %s484_s4 }
  0x30   : > { %p481_p11 = pnand %p479_p10, %p467_p9  ;;  %p487_p13 = scmp.lt.s32.totalorder %s485_s17, %s478_s25 }
  0x32   : > { %p482_p5 = pneg %p481_p11  ;;  %p488_p0 = por %p487_p13, %p486_p12 }
  0x34   : > { %p489_p2 = pnand %p488_p0, %p482_p5 }
  0x36   : > { %492 = shalt.err (!%p489_p2)
}
  0x37   : > { %353 = dma.hbm_to_vmem [thread:$0]  (!%p773_p4), %s256_s27, 32, %s145_s5, %s128_s16  }
  0x38   : > { %p150_p3 = pnand %p334_p6, %p149_p8 }
  0x39   : > { %s155_s22 = sand.u32 (!%p150_p3), 1, %s598_s10  }
  0x3a   : > { %153 = sbr.rel (%p150_p3) target bundleno = 112 (0x70), region = 24  ;;  %s335_s23 = sshll.u32 (!%p150_p3), %s155_s22, 1 }
  0x3b   : > { %s156_s20 = scalar_lea.sflag (!%p150_p3), [#allocation3], %s155_s22  ;;  %s159_s2 = scalar_lea.vmem (!%p150_p3), [#allocation2], %s335_s23 }
  0x3f   : > { %573 = dma.done.wait (%p732_p7), %s156_s20, 32  }
  0x40   : > { %575 = vsyncadd (%p732_p7), %s156_s20, 4294967264  ;;  %s175_s17 = sand.u32 1, %s586_s7   ;;  %p337_p4 = scmp.ne.s32.totalorder %s606_s12, 0 }
  0x41   : > { %s336_s3 = sshll.u32 %s175_s17, 1 }
  0x42   : > { %s177_s15 = scalar_lea.vmem [#allocation5], %s336_s3  ;;  %184 = sbr.rel (%p337_p4) target bundleno = 75 (0x4b), region = 32 }
  0x47   : > { %v185_v0 = vld [vmem:[%s159_s2] sm:$0x3]  ;;  %v187_v1 = vlaneseq }
  0x48   : > { %v186_v2 = vadd.f32 6.0, %v185_v0 }
  0x49   : > { %vm189_vm0 = vcmp.lt.s32.totalorder %v187_v1, 256 }
  0x4a   : > { %191 = vst.msk [vmem:[%s177_s15] sm:$0x3] %vm189_vm0, %v186_v2 }
  0x4b PF: > { %p338_p3 = scmp.ne.s32.totalorder %s606_s12, 1 }
  0x4d   : > { %195 = sbr.rel (%p338_p3) target bundleno = 86 (0x56), region = 36 }
  0x52   : > { %v196_v3 = vlaneseq  ;;  %v633_v4 = vmov 6.0  }
  0x54   : > { %vm198_vm1 = vcmp.lt.s32.totalorder %v196_v3, 256 }
  0x55   : > { %200 = vst.msk [vmem:[%s177_s15] sm:$0x3] %vm198_vm1, %v633_v4 }
  0x56 PF: > { %s340_s16 = sshll.u32 %s606_s12, 2  ;;  %s342_s27 = sshll.u32 %s614_s14, 4 }
  0x57   : > { %s210_s28 = sadd.s32 %s610_s13, %s340_s16  ;;  %s222_s9 = sshll.u32 %s177_s15, 4  ;;  %s223_s9 = int_to_ptr.vmem [resolvable:$true] %s222_s9 }
  0x58   : > { %s341_s5 = sshll.u32 %s210_s28, 1  ;;  %s202_s22 = scalar_lea.sflag [#allocation4], %s175_s17 }
  0x59   : > { %s218_s24 = sadd.s32 %s342_s27, %s341_s5  ;;  %s494_s23 = scalar_lea.vmem %s223_s9, 32 }
  0x5a   : > { %s343_s30 = sshll.u32 %s218_s24, 4  ;;  %p495_p7 = scmp.ne.s32.totalorder %s223_s9, %s494_s23 }
  0x5b   : > { %s220_s4 = scalar_lea.hbm %s866_s1, %s343_s30  ;;  %s634_s20 = smov [#allocation5]  }
  0x5c   : > { %p496_p6 = pnand %p495_p7, %p759_p1  ;;  %s498_s2 = sshll.u32 %s634_s20, 4  ;;  %s499_s2 = int_to_ptr.vmem [resolvable:$false] %s498_s2 }
  0x5d   : > { %s500_s12 = scalar_lea.vmem %s499_s2, 64  ;;  %p501_p9 = scmp.lt.s32.totalorder %s223_s9, %s499_s2 }
  0x5e   : > { %p497_p8 = pneg %p496_p6  ;;  %p502_p10 = scmp.lt.s32.totalorder %s500_s12, %s494_s23 }
  0x60   : > { %p503_p11 = por %p502_p10, %p501_p9 }
  0x62   : > { %p504_p5 = pnand %p503_p11, %p497_p8 }
  0x64   : > { %507 = shalt.err (!%p504_p5)
}
  0x65   : > { %s508_s13 = scalar_lea.hbm %s220_s4, 32  ;;  %s512_s3 = scalar_lea.hbm %s866_s1, 512 }
  0x66   : > { %p509_p12 = scmp.ne.s32.totalorder %s220_s4, %s508_s13  ;;  %p513_p2 = scmp.lt.s32.totalorder %s220_s4, %s866_s1 }
  0x67   : > { %p514_p4 = scmp.lt.s32.totalorder %s512_s3, %s508_s13 }
  0x68   : > { %p510_p13 = pnand %p509_p12, %p759_p1 }
  0x69   : > { %p515_p3 = por %p514_p4, %p513_p2 }
  0x6a   : > { %p511_p0 = pneg %p510_p13 }
  0x6c   : > { %p516_p7 = pnand %p515_p3, %p511_p0 }
  0x6e   : > { %519 = shalt.err (!%p516_p7)
}
  0x6f   : > { %348 = dma.vmem_to_hbm [thread:$0]  (%p759_p1), %s223_s9, 32, %s220_s4, %s202_s22  }
  0x70 PF: > { %p359_p6 = scmp.ge.s32.totalorder %s630_s18, 2  ;;  %s234_s28 = sand.u32 1, %s582_s6  }
  0x71   : > { %p888_p8 = scmp.ne.s32.totalorder %s886_s19, 0  ;;  %s235_s27 = scalar_lea.sflag [#allocation4], %s234_s28 }
  0x73   : > { %p355_p9 = pnand %p359_p6, %p888_p8 }
  0x75   : > { %p356_p10 = pneg %p355_p9 }
  0x77   : > { %577 = dma.done.wait (%p356_p10), %s235_s27, 32  }
  0x78   : > { %579 = vsyncadd (%p356_p10), %s235_s27, 4294967264  ;;  %s17_s18 = sadd.s32 1, %s630_s18   ;;  %s890_s29 = sld [smem:[#allocation14_spill]] }
  0x79   : > { %p821_p11 = scmp.ge.s32.totalorder %s17_s18, 18   ;;  %s891_s12 = sld [smem:[#allocation8_spill]] }
  0x7a   : > { %s892_s13 = sld [smem:[#allocation9_spill]]  ;;  %s897_s6 = smov %s586_s7 }
  0x7b   : > { %s893_s14 = sld [smem:[#allocation10_spill]]  ;;  %s898_s7 = smov %s590_s8 }
  0x7c   : > { %s894_s15 = sld [smem:[#allocation11_spill]]  ;;  %s899_s8 = smov %s751_s21 }
  0x7d   : > { %s895_s16 = sld [smem:[#allocation12_spill]]  ;;  %s900_s9 = smov %s598_s10 }
  0x7e   : > { %s896_s17 = sld [smem:[#allocation13_spill]]  ;;  %s901_s10 = smov %s602_s11 }
  0x7f   : > { %s902_s11 = smov %s890_s29  ;;  %16 = sbr.rel (!%p821_p11) target bundleno = 10 (0xa), region = 77 }
  0x84   :  { %240 = vsyncpa [#allocation3], 1 }
  0x85   :  { %242 = vsyncpa [#allocation3 + $0x1], 1 }
  0x86   :  { %243 = vsyncpa [#allocation4], 1 }
  0x87   :  { %245 = vsyncpa [#allocation4 + $0x1], 1 }

</bundles_post_ra>
